<compile_context>
chip_gen: v7x
topology: tpu7x:2x2x1
jax: 0.10.0
libtpu: 0.0.40
codegen_flags: <defaults>
</compile_context>

<pallas_src>
import functools

import jax
import jax.numpy as jnp
from jax.experimental import pallas as pl
from jax.experimental.pallas import tpu as pltpu

HIDDEN = 256
LANE = 128


def _round_up(x, m):
    return ((x + m - 1) // m) * m


def _choose_tile(batch, batch_tile=None):
    """Pick batch tile TB (multiple of 8) and padded batch size."""
    b8 = _round_up(batch, 8)
    if batch_tile is not None:
        tb = _round_up(max(8, min(batch_tile, b8)), 8)      # enforce sublane rule
    elif b8 <= 2048:
        tb = b8                                             # single grid step
    else:
        tb = _round_up((b8 + 1) // 2, 8)                    # 2 tiles (v7x megacore)
    return tb, _round_up(b8, tb)


def _actor_kernel(x_ref, w1_ref, b1_ref, w2_ref, b2_ref, w3_ref, b3_ref,
                  mean_ref):
    # One batch tile [TB, S_r] -> [TB, A_pad]; three MXU matmuls with f32
    # accumulation, bias adds and ReLUs on the VPU.
    x = x_ref[...]

    h1 = jnp.dot(x, w1_ref[...], preferred_element_type=jnp.float32)
    h1 = jnp.maximum(h1 + b1_ref[...], 0.0)

    h2 = jnp.dot(h1.astype(w2_ref.dtype), w2_ref[...],
                 preferred_element_type=jnp.float32)
    h2 = jnp.maximum(h2 + b2_ref[...], 0.0)

    mean = jnp.dot(h2.astype(w3_ref.dtype), w3_ref[...],
                   preferred_element_type=jnp.float32) + b3_ref[...]
    mean_ref[...] = mean.astype(mean_ref.dtype)


def prepare_params(params, *, use_bf16=True):
    """One-time pad/cast of weights & biases (hoisted out of the hot path).

    Returns a dict of device arrays; all shape/dtype metadata the forward
    needs is recoverable from the array shapes at trace time.
    """
    w1, b1 = params["w1"], params["b1"]
    w2, b2 = params["w2"], params["b2"]
    w3, b3 = params["w3"], params["b3"]
    log_std = params["log_std"]

    S = w1.shape[0]
    A = w3.shape[1]
    compute_dtype = jnp.bfloat16 if use_bf16 else jnp.float32

    s_mult = 16 if use_bf16 else 8            # sublane packing for w1's K axis
    S_r = _round_up(max(S, s_mult), s_mult)
    A_pad = _round_up(max(A, LANE), LANE)     # lane-dense output stores

    prep = dict(
        w1=jnp.pad(w1, ((0, S_r - S), (0, 0))).astype(compute_dtype),
        w2=w2.astype(compute_dtype),
        w3=jnp.pad(w3, ((0, 0), (0, A_pad - A))).astype(compute_dtype),
        # Biases stay f32 (added to the f32 accumulator) as 2-D rows.
        b1=b1.reshape(1, HIDDEN).astype(jnp.float32),
        b2=b2.reshape(1, HIDDEN).astype(jnp.float32),
        b3=jnp.pad(b3, ((0, A_pad - A),)).reshape(1, A_pad).astype(jnp.float32),
        # std = exp(log_std): input-independent, computed once here.
        std=jnp.exp(log_std.astype(jnp.float32)),            # shape [A]
    )
    return jax.tree_util.tree_map(jnp.asarray, prep)


@functools.partial(jax.jit, static_argnames=("batch_tile",))
def actor_forward(state, prep, *, batch_tile=None):
    """state: [B, state_dim] f32.  Returns (mean [B, A] f32, std [B, A] f32)."""
    w1, b1 = prep["w1"], prep["b1"]
    w2, b2 = prep["w2"], prep["b2"]
    w3, b3 = prep["w3"], prep["b3"]

    B, S = state.shape
    S_r = w1.shape[0]
    A_pad = w3.shape[1]
    A = prep["std"].shape[0]
    compute_dtype = w1.dtype

    TB, B_pad = _choose_tile(B, batch_tile)
    n_tiles = B_pad // TB

    # Only the state is padded/cast per call (weights were prepared once).
    x_p = jnp.pad(state, ((0, B_pad - B), (0, S_r - S))).astype(compute_dtype)

    bpe = jnp.dtype(compute_dtype).itemsize
    cost = pl.CostEstimate(
        flops=2 * B_pad * (S_r * HIDDEN + HIDDEN * HIDDEN + HIDDEN * A_pad),
        transcendentals=0,
        bytes_accessed=(B_pad * S_r * bpe                     # x in
                        + (S_r * HIDDEN + HIDDEN * HIDDEN
                           + HIDDEN * A_pad) * bpe            # weights
                        + (2 * HIDDEN + A_pad) * 4            # biases
                        + B_pad * A_pad * 4),                 # mean out
    )

    # Weights/biases: constant block index -> resident in VMEM across tiles.
    const = lambda i: (0, 0)
    mean_p = pl.pallas_call(
        _actor_kernel,
        out_shape=jax.ShapeDtypeStruct((B_pad, A_pad), jnp.float32),
        grid=(n_tiles,),
        in_specs=[
            pl.BlockSpec((TB, S_r), lambda i: (i, 0)),        # x  (tiled)
            pl.BlockSpec((S_r, HIDDEN), const),               # w1 (resident)
            pl.BlockSpec((1, HIDDEN), const),                 # b1
            pl.BlockSpec((HIDDEN, HIDDEN), const),            # w2
            pl.BlockSpec((1, HIDDEN), const),                 # b2
            pl.BlockSpec((HIDDEN, A_pad), const),             # w3
            pl.BlockSpec((1, A_pad), const),                  # b3
        ],
        out_specs=pl.BlockSpec((TB, A_pad), lambda i: (i, 0)),  # mean (tiled)
        compiler_params=pltpu.CompilerParams(
            dimension_semantics=("parallel",)),               # v7x megacore
        cost_estimate=cost,
    )(x_p, w1, b1, w2, b2, w3, b3)

    mean = mean_p[:B, :A]
    std = jnp.broadcast_to(prep["std"], (B, A))
    return mean, std


def init_params(key, state_dim, action_dim):
    """Deterministic synthetic init (PyTorch-like uniform fan-in scaling)."""
    ks = jax.random.split(key, 6)

    def linear(kw, kb, fan_in, fan_out):
        bound = 1.0 / jnp.sqrt(fan_in)
        w = jax.random.uniform(kw, (fan_in, fan_out), jnp.float32, -bound, bound)
        b = jax.random.uniform(kb, (fan_out,), jnp.float32, -bound, bound)
        return w, b

    w1, b1 = linear(ks[0], ks[1], state_dim, HIDDEN)
    w2, b2 = linear(ks[2], ks[3], HIDDEN, HIDDEN)
    w3, b3 = linear(ks[4], ks[5], HIDDEN, action_dim)
    log_std = jnp.zeros((action_dim,), jnp.float32)   # nn.Parameter(torch.zeros(A))
    return dict(w1=w1, b1=b1, w2=w2, b2=b2, w3=w3, b3=b3, log_std=log_std)


def actor_forward_ref(state, p):
    h1 = jnp.maximum(state @ p["w1"] + p["b1"], 0.0)
    h2 = jnp.maximum(h1 @ p["w2"] + p["b2"], 0.0)
    mean = h2 @ p["w3"] + p["b3"]
    std = jnp.broadcast_to(jnp.exp(p["log_std"]), mean.shape)
    return mean, std


if __name__ == "__main__":
    key = jax.random.PRNGKey(0)
    k_param, k_state = jax.random.split(key)

    batch, state_dim, action_dim = 8, 32, 8
    params = init_params(k_param, state_dim, action_dim)
    state = jax.random.normal(k_state, (batch, state_dim), jnp.float32)

    mean_ref, std_ref = actor_forward_ref(state, params)

    # bf16 MXU path (the new default; v5e/v6e/v7x fast path).
    prep_bf16 = prepare_params(params)            # use_bf16=True by default
    mean_bf, std_bf = jax.block_until_ready(actor_forward(state, prep_bf16))
    assert mean_bf.shape == (batch, action_dim) and std_bf.shape == (batch, action_dim)
    assert jnp.all(jnp.isfinite(mean_bf))
    assert jnp.allclose(mean_bf, mean_ref, atol=5e-2, rtol=5e-2)
    assert jnp.allclose(std_bf, std_ref, atol=1e-6, rtol=1e-6)

    # f32 path: bit-for-bit-ish vs reference (for PPO log-prob evaluation).
    prep_f32 = prepare_params(params, use_bf16=False)
    mean, std = jax.block_until_ready(actor_forward(state, prep_f32))
    assert jnp.allclose(mean, mean_ref, atol=1e-5, rtol=1e-5)
    assert jnp.allclose(std, std_ref, atol=1e-6, rtol=1e-6)

    # Larger, non-multiple-of-8 batch: auto policy -> single grid step.
    big_state = jax.random.normal(k_state, (1000, state_dim), jnp.float32)
    mean_big_ref, _ = actor_forward_ref(big_state, params)
    mean_big, _ = jax.block_until_ready(actor_forward(big_state, prep_f32))
    assert mean_big.shape == (1000, action_dim)
    assert jnp.allclose(mean_big, mean_big_ref, atol=1e-5, rtol=1e-5)

    # Exercise the multi-tile grid path explicitly (batch_tile not a multiple
    # of 8 is rounded up internally).
    mean_big2, _ = jax.block_until_ready(
        actor_forward(big_state, prep_bf16, batch_tile=252))
    assert mean_big2.shape == (1000, action_dim)
    assert jnp.allclose(mean_big2, mean_big_ref, atol=5e-2, rtol=5e-2)

    print("KERNEL_OK")
</pallas_src>

<mosaic_0001>
module attributes {stable_mosaic.version = 11 : i64} {
  func.func @_actor_kernel(%arg0: i32, %arg1: memref<8x32xbf16, #tpu.memory_space<vmem>>, %arg2: memref<32x256xbf16, #tpu.memory_space<vmem>>, %arg3: memref<1x256xf32, #tpu.memory_space<vmem>>, %arg4: memref<256x256xbf16, #tpu.memory_space<vmem>>, %arg5: memref<1x256xf32, #tpu.memory_space<vmem>>, %arg6: memref<256x128xbf16, #tpu.memory_space<vmem>>, %arg7: memref<1x128xf32, #tpu.memory_space<vmem>>, %arg8: memref<8x128xf32, #tpu.memory_space<vmem>>) attributes {dimension_semantics = [#tpu.dimension_semantics<parallel>], iteration_bounds = array<i64: 1>, scalar_prefetch = 0 : i64, scratch_operands = 0 : i64, tpu.core_type = #tpu.core_type<tc>, window_params = [{transform_indices = @transform_0, window_bounds = array<i64: 8, 32>}, {pipeline_mode = #tpu.pipeline_mode<synchronous>, transform_indices = @transform_1, window_bounds = array<i64: 32, 256>}, {pipeline_mode = #tpu.pipeline_mode<synchronous>, transform_indices = @transform_2, window_bounds = array<i64: 1, 256>}, {pipeline_mode = #tpu.pipeline_mode<synchronous>, transform_indices = @transform_3, window_bounds = array<i64: 256, 256>}, {pipeline_mode = #tpu.pipeline_mode<synchronous>, transform_indices = @transform_4, window_bounds = array<i64: 1, 256>}, {pipeline_mode = #tpu.pipeline_mode<synchronous>, transform_indices = @transform_5, window_bounds = array<i64: 256, 128>}, {pipeline_mode = #tpu.pipeline_mode<synchronous>, transform_indices = @transform_6, window_bounds = array<i64: 1, 128>}, {transform_indices = @transform_7, window_bounds = array<i64: 8, 128>}]} {
    %c0 = arith.constant 0 : index
    %c0_0 = arith.constant 0 : index
    %0 = vector.load %arg1[%c0, %c0_0] : memref<8x32xbf16, #tpu.memory_space<vmem>>, vector<8x32xbf16>
    %c0_1 = arith.constant 0 : index
    %c0_2 = arith.constant 0 : index
    %1 = vector.load %arg2[%c0_1, %c0_2] : memref<32x256xbf16, #tpu.memory_space<vmem>>, vector<32x256xbf16>
    %cst = arith.constant dense<0.000000e+00> : vector<8x256xf32>
    %2 = tpu.matmul %0, %1, %cst {dimension_numbers = #tpu.dot_dimension_numbers<[1], [0], [0], [1], [0, 0, 1, 1], [], []>} : vector<8x32xbf16>, vector<32x256xbf16>, vector<8x256xf32> -> vector<8x256xf32>
    %c0_3 = arith.constant 0 : index
    %c0_4 = arith.constant 0 : index
    %3 = vector.load %arg3[%c0_3, %c0_4] : memref<1x256xf32, #tpu.memory_space<vmem>>, vector<1x256xf32>
    %4 = vector.broadcast %3 : vector<1x256xf32> to vector<8x256xf32>
    %5 = arith.addf %2, %4 : vector<8x256xf32>
    %cst_5 = arith.constant 0.000000e+00 : f32
    %6 = vector.broadcast %cst_5 : f32 to vector<8x256xf32>
    %7 = arith.maximumf %5, %6 : vector<8x256xf32>
    %8 = arith.truncf %7 : vector<8x256xf32> to vector<8x256xbf16>
    %c0_6 = arith.constant 0 : index
    %c0_7 = arith.constant 0 : index
    %9 = vector.load %arg4[%c0_6, %c0_7] : memref<256x256xbf16, #tpu.memory_space<vmem>>, vector<256x256xbf16>
    %cst_8 = arith.constant dense<0.000000e+00> : vector<8x256xf32>
    %10 = tpu.matmul %8, %9, %cst_8 {dimension_numbers = #tpu.dot_dimension_numbers<[1], [0], [0], [1], [0, 0, 1, 1], [], []>} : vector<8x256xbf16>, vector<256x256xbf16>, vector<8x256xf32> -> vector<8x256xf32>
    %c0_9 = arith.constant 0 : index
    %c0_10 = arith.constant 0 : index
    %11 = vector.load %arg5[%c0_9, %c0_10] : memref<1x256xf32, #tpu.memory_space<vmem>>, vector<1x256xf32>
    %12 = vector.broadcast %11 : vector<1x256xf32> to vector<8x256xf32>
    %13 = arith.addf %10, %12 : vector<8x256xf32>
    %cst_11 = arith.constant 0.000000e+00 : f32
    %14 = vector.broadcast %cst_11 : f32 to vector<8x256xf32>
    %15 = arith.maximumf %13, %14 : vector<8x256xf32>
    %16 = arith.truncf %15 : vector<8x256xf32> to vector<8x256xbf16>
    %c0_12 = arith.constant 0 : index
    %c0_13 = arith.constant 0 : index
    %17 = vector.load %arg6[%c0_12, %c0_13] : memref<256x128xbf16, #tpu.memory_space<vmem>>, vector<256x128xbf16>
    %cst_14 = arith.constant dense<0.000000e+00> : vector<8x128xf32>
    %18 = tpu.matmul %16, %17, %cst_14 {dimension_numbers = #tpu.dot_dimension_numbers<[1], [0], [0], [1], [0, 0, 1, 1], [], []>} : vector<8x256xbf16>, vector<256x128xbf16>, vector<8x128xf32> -> vector<8x128xf32>
    %c0_15 = arith.constant 0 : index
    %c0_16 = arith.constant 0 : index
    %19 = vector.load %arg7[%c0_15, %c0_16] : memref<1x128xf32, #tpu.memory_space<vmem>>, vector<1x128xf32>
    %20 = vector.broadcast %19 : vector<1x128xf32> to vector<8x128xf32>
    %21 = arith.addf %18, %20 : vector<8x128xf32>
    %c0_17 = arith.constant 0 : index
    %c0_18 = arith.constant 0 : index
    %22 = vector.load %arg8[%c0_17, %c0_18] : memref<8x128xf32, #tpu.memory_space<vmem>>, vector<8x128xf32>
    tpu.vector_store %arg8[%c0_17, %c0_18], %21 {strides = array<i32>} : memref<8x128xf32, #tpu.memory_space<vmem>>, vector<8x128xf32>,
    return
  }
  func.func @transform_0(%arg0: i32) -> (i32, i32) {
    %c0_i32 = arith.constant 0 : i32
    %c0_i32_0 = arith.constant 0 : i32
    return %arg0, %c0_i32 : i32, i32
  }
  func.func @transform_1(%arg0: i32) -> (i32, i32) {
    %c0_i32 = arith.constant 0 : i32
    %c0_i32_0 = arith.constant 0 : i32
    %c0_i32_1 = arith.constant 0 : i32
    return %c0_i32, %c0_i32_0 : i32, i32
  }
  func.func @transform_2(%arg0: i32) -> (i32, i32) {
    %c0_i32 = arith.constant 0 : i32
    %c0_i32_0 = arith.constant 0 : i32
    %c0_i32_1 = arith.constant 0 : i32
    return %c0_i32, %c0_i32_0 : i32, i32
  }
  func.func @transform_3(%arg0: i32) -> (i32, i32) {
    %c0_i32 = arith.constant 0 : i32
    %c0_i32_0 = arith.constant 0 : i32
    %c0_i32_1 = arith.constant 0 : i32
    return %c0_i32, %c0_i32_0 : i32, i32
  }
  func.func @transform_4(%arg0: i32) -> (i32, i32) {
    %c0_i32 = arith.constant 0 : i32
    %c0_i32_0 = arith.constant 0 : i32
    %c0_i32_1 = arith.constant 0 : i32
    return %c0_i32, %c0_i32_0 : i32, i32
  }
  func.func @transform_5(%arg0: i32) -> (i32, i32) {
    %c0_i32 = arith.constant 0 : i32
    %c0_i32_0 = arith.constant 0 : i32
    %c0_i32_1 = arith.constant 0 : i32
    return %c0_i32, %c0_i32_0 : i32, i32
  }
  func.func @transform_6(%arg0: i32) -> (i32, i32) {
    %c0_i32 = arith.constant 0 : i32
    %c0_i32_0 = arith.constant 0 : i32
    %c0_i32_1 = arith.constant 0 : i32
    return %c0_i32, %c0_i32_0 : i32, i32
  }
  func.func @transform_7(%arg0: i32) -> (i32, i32) {
    %c0_i32 = arith.constant 0 : i32
    %c0_i32_0 = arith.constant 0 : i32
    return %arg0, %c0_i32 : i32, i32
  }
}

</mosaic_0001>

<bundles_post_ra>
// kernel: actor_forward.1
= control target key start
LH: loop header
LB: loop body
LE: loop exit
PB: predicated region body
PF: predicated region fallthrough
CT: control target
= control target key end

     0   :  { %12 = vsyncpa [#allocation3], 0  ;;  %s961_s0 = inlined_call_operand.vmem [shape: bf16[8,32], index: 0, kind: input, shape index: {}]   ;;  %s962_s1 = inlined_call_operand.hbm [shape: bf16[32,256], index: 1, kind: input, shape index: {}]   ;;  %s963_s2 = inlined_call_operand.vmem [shape: f32[1,256], index: 2, kind: input, shape index: {}]   ;;  %s964_s3 = inlined_call_operand.hbm [shape: bf16[256,256], index: 3, kind: input, shape index: {}]   ;;  %s965_s4 = inlined_call_operand.vmem [shape: f32[1,256], index: 4, kind: input, shape index: {}]   ;;  %s966_s5 = inlined_call_operand.hbm [shape: bf16[256,128], index: 5, kind: input, shape index: {}]   ;;  %s967_s6 = inlined_call_operand.vmem [shape: f32[1,128], index: 6, kind: input, shape index: {}]   ;;  %s968_s7 = inlined_call_operand.hbm [shape: f32[8,128], index: 7, kind: output, shape index: {}]  }
   0x1   :  { %13 = vsyncpa [#allocation6], 0 }
   0x2   :  { %14 = vsyncpa [#allocation4], 0  ;;  %s845_s24 = smov [#allocation5]   ;;  %s846_s26 = smov [#allocation2]  }
   0x3   :  { %s36_s25 = sshll.u32 %s845_s24, 4  ;;  %s22_s27 = sshll.u32 %s846_s26, 4  ;;  %s37_s25 = int_to_ptr.vmem [resolvable:$true] %s36_s25  ;;  %s894_s27 = int_to_ptr.vmem [resolvable:$true] %s22_s27 }
   0x4   :  { %s751_s30 = scalar_lea.hbm %s964_s3, 4096 }
   0x5   :  { %p752_p0 = scmp.ne.s32.totalorder %s964_s3, %s751_s30  ;;  %p755_p1 = scmp.lt.u32.totalorder %s751_s30, %s964_s3 }
   0x7   :  { %p757_p2 = pnand %p755_p1, %p752_p0 }
   0x9   :  { %760 = shalt.err (!%p757_p2)
}
   0xa   :  { %s761_s12 = scalar_lea.vmem %s37_s25, 4096  ;;  %p766_p4 = scmp.lt.s32.totalorder %s37_s25, %s37_s25 }
   0xb   :  { %p762_p3 = scmp.ne.s32.totalorder %s37_s25, %s761_s12  ;;  %p767_p5 = scmp.lt.s32.totalorder %s761_s12, %s761_s12 }
   0xd   :  { %p768_p6 = por %p767_p5, %p766_p4 }
   0xf   :  { %p769_p7 = pnand %p768_p6, %p762_p3 }
  0x11   :  { %772 = shalt.err (!%p769_p7)
}
  0x12   :  { %s847_s13 = smov 128   ;;  %s848_s14 = smov 8  }
  0x13   :  { %42 = dma.hbm_to_vmem [thread:$0]  %s964_s3, 4096, %s37_s25, [#allocation6], %s847_s13, %s847_s13, %s848_s14  }
  0x14   :  { %s773_s19 = scalar_lea.hbm %s962_s1, 512 }
  0x15   :  { %p774_p8 = scmp.ne.s32.totalorder %s962_s1, %s773_s19  ;;  %p777_p9 = scmp.lt.u32.totalorder %s773_s19, %s962_s1 }
  0x17   :  { %p779_p10 = pnand %p777_p9, %p774_p8 }
  0x19   :  { %782 = shalt.err (!%p779_p10)
}
  0x1a   :  { %s783_s24 = scalar_lea.vmem %s894_s27, 512  ;;  %p788_p12 = scmp.lt.s32.totalorder %s894_s27, %s894_s27 }
  0x1b   :  { %p784_p11 = scmp.ne.s32.totalorder %s894_s27, %s783_s24  ;;  %p789_p13 = scmp.lt.s32.totalorder %s783_s24, %s783_s24 }
  0x1d   :  { %p790_p0 = por %p789_p13, %p788_p12 }
  0x1f   :  { %p791_p1 = pnand %p790_p0, %p784_p11 }
  0x21   :  { %794 = shalt.err (!%p791_p1)
}
  0x22   :  { %28 = dma.hbm_to_vmem [thread:$0]  %s962_s1, 512, %s894_s27, [#allocation3], %s847_s13, %s847_s13, %s848_s14  }
  0x23   :  { %s849_s26 = smov [#allocation7]   ;;  %s795_s8 = scalar_lea.hbm %s966_s5, 2048 }
  0x24   :  { %s50_s28 = sshll.u32 %s849_s26, 4  ;;  %p796_p2 = scmp.ne.s32.totalorder %s966_s5, %s795_s8  ;;  %s51_s28 = int_to_ptr.vmem [resolvable:$true] %s50_s28 }
  0x25   :  { %p799_p3 = scmp.lt.u32.totalorder %s795_s8, %s966_s5 }
  0x27   :  { %p801_p4 = pnand %p799_p3, %p796_p2 }
  0x29   :  { %804 = shalt.err (!%p801_p4)
}
  0x2a   :  { %s805_s15 = scalar_lea.vmem %s51_s28, 2048  ;;  %p810_p6 = scmp.lt.s32.totalorder %s51_s28, %s51_s28 }
  0x2b   :  { %p806_p5 = scmp.ne.s32.totalorder %s51_s28, %s805_s15  ;;  %p811_p7 = scmp.lt.s32.totalorder %s805_s15, %s805_s15 }
  0x2d   :  { %p812_p8 = por %p811_p7, %p810_p6 }
  0x2f   :  { %p813_p9 = pnand %p812_p8, %p806_p5 }
  0x31   :  { %816 = shalt.err (!%p813_p9)
}
  0x32   :  { %s850_s1 = smov 64   ;;  %s851_s27 = smov 4  }
  0x33   :  { %56 = dma.hbm_to_vmem [thread:$0]  %s966_s5, 2048, %s51_s28, [#allocation6], %s850_s1, %s850_s1, %s851_s27  }
  0x34   :  { %839 = dma.done.wait [#allocation3], 512  }
  0x35   :  { %840 = vsyncadd [#allocation3], 4294966784 }
  0x36   :  { %841 = dma.done.wait [#allocation6], 6144  }
  0x37   :  { %842 = vsyncadd [#allocation6], 4294961152  ;;  %v852_v0 = vmov 0   ;;  %v681_v1 = vld [vmem:[#allocation2 + $0x4] ss:$8 sps:$4 sm:$0xff]   ;;  %vm106_vm0 = vcmask 261120   ;;  %v76_v50 = vlaneseq }
  0x38   :  { %142 = vmatprep.mubr.bf16.mxu0 %v852_v0  ;;  %v683_v2 = vld [vmem:[#allocation2] ss:$8 sps:$4 sm:$0xff]   ;;  %110 = vmatprep.subr.bf16.mxu0 %v681_v1  ;;  %v684_v3 = vld [vmem:[#allocation2 + $0x14] ss:$8 sps:$4 sm:$0xff]   ;;  %v686_v4 = vld [vmem:[#allocation2 + $0x10] ss:$8 sps:$4 sm:$0xff]  }
  0x39   :  { %111 = vmatpush1.bf16.msra.mxu0 %v683_v2  ;;  %v687_v5 = vld [vmem:[#allocation5 + $0x4] ss:$8 sps:$4 sm:$0xff]   ;;  %v689_v6 = vld [vmem:[#allocation5] ss:$8 sps:$4 sm:$0xff]   ;;  %v690_v7 = vld [vmem:[#allocation5 + $0x14] ss:$8 sps:$4 sm:$0xff]  }
  0x3a   :  { %112 = vmatprep.subr.bf16.mxu0 %v684_v3  ;;  %359 = vmatprep.subr.bf16.mxu1 %v687_v5  ;;  %v69_v8 = vld [vmem:[%s961_s0] sm:$0xf]  ;;  %v692_v9 = vld [vmem:[#allocation5 + $0x10] ss:$8 sps:$4 sm:$0xff]   ;;  %v693_v10 = vld [vmem:[#allocation5 + $0x24] ss:$8 sps:$4 sm:$0xff]  }
  0x3b   :  { %360 = vmatpush1.bf16.msra.mxu1 %v689_v6  ;;  %v695_v11 = vld [vmem:[#allocation5 + $0x20] ss:$8 sps:$4 sm:$0xff]   ;;  %v696_v12 = vld [vmem:[#allocation5 + $0x34] ss:$8 sps:$4 sm:$0xff]   ;;  %v698_v13 = vld [vmem:[#allocation5 + $0x30] ss:$8 sps:$4 sm:$0xff]  }
  0x3c   :  { %361 = vmatprep.subr.bf16.mxu1 %v690_v7  ;;  %v699_v14 = vld [vmem:[#allocation5 + $0x44] ss:$8 sps:$4 sm:$0xff]   ;;  %v701_v15 = vld [vmem:[#allocation5 + $0x40] ss:$8 sps:$4 sm:$0xff]   ;;  %v702_v16 = vld [vmem:[#allocation5 + $0x54] ss:$8 sps:$4 sm:$0xff]  }
  0x3d   :  { %113 = vmatpush1.bf16.msra.mxu0 %v686_v4  ;;  %v704_v17 = vld [vmem:[#allocation5 + $0x50] ss:$8 sps:$4 sm:$0xff]   ;;  %v705_v18 = vld [vmem:[#allocation5 + $0x64] ss:$8 sps:$4 sm:$0xff]   ;;  %v707_v19 = vld [vmem:[#allocation5 + $0x60] ss:$8 sps:$4 sm:$0xff]  }
  0x3e   :  { %v708_v20 = vld [vmem:[#allocation5 + $0x74] ss:$8 sps:$4 sm:$0xff]   ;;  %v710_v21 = vld [vmem:[#allocation5 + $0x70] ss:$8 sps:$4 sm:$0xff]   ;;  %v711_v22 = vld [vmem:[#allocation5 + $0x84] ss:$8 sps:$4 sm:$0xff]  }
  0x3f   :  { %362 = vmatpush1.bf16.msra.mxu1 %v692_v9  ;;  %v713_v23 = vld [vmem:[#allocation5 + $0x80] ss:$8 sps:$4 sm:$0xff]   ;;  %v714_v24 = vld [vmem:[#allocation5 + $0x94] ss:$8 sps:$4 sm:$0xff]   ;;  %v716_v25 = vld [vmem:[#allocation5 + $0x90] ss:$8 sps:$4 sm:$0xff]  }
  0x40   :  { %600 = vmatmul.mubr.msk.bf16.vlgmr.msra.gmra.mrb[0].mxu0 %vm106_vm0, %v69_v8  ;;  %363 = vmatprep.subr.bf16.mxu1 %v693_v10  ;;  %v717_v26 = vld [vmem:[#allocation5 + $0xa4] ss:$8 sps:$4 sm:$0xff]   ;;  %v719_v27 = vld [vmem:[#allocation5 + $0xa0] ss:$8 sps:$4 sm:$0xff]   ;;  %v720_v28 = vld [vmem:[#allocation5 + $0xb4] ss:$8 sps:$4 sm:$0xff]  }
  0x41   :  { %v722_v29 = vld [vmem:[#allocation5 + $0xb0] ss:$8 sps:$4 sm:$0xff]   ;;  %v723_v30 = vld [vmem:[#allocation5 + $0xc4] ss:$8 sps:$4 sm:$0xff]   ;;  %v725_v31 = vld [vmem:[#allocation5 + $0xc0] ss:$8 sps:$4 sm:$0xff]  }
  0x42   :  { %v726_v32 = vld [vmem:[#allocation5 + $0xd4] ss:$8 sps:$4 sm:$0xff]   ;;  %v728_v33 = vld [vmem:[#allocation5 + $0xd0] ss:$8 sps:$4 sm:$0xff]   ;;  %v729_v34 = vld [vmem:[#allocation5 + $0xe4] ss:$8 sps:$4 sm:$0xff]  }
  0x43   :  { %364 = vmatpush1.bf16.msra.mxu1 %v695_v11  ;;  %v731_v35 = vld [vmem:[#allocation5 + $0xe0] ss:$8 sps:$4 sm:$0xff]   ;;  %v732_v36 = vld [vmem:[#allocation5 + $0xf4] ss:$8 sps:$4 sm:$0xff]   ;;  %v734_v37 = vld [vmem:[#allocation5 + $0xf0] ss:$8 sps:$4 sm:$0xff]  }
  0x44   :  { %365 = vmatprep.subr.bf16.mxu1 %v696_v12  ;;  %v735_v38 = vld [vmem:[#allocation7 + $0x40] sm:$0xff]   ;;  %v737_v40 = vld [vmem:[#allocation7 + $0x48] sm:$0xff]   ;;  %v739_v42 = vld [vmem:[#allocation7 + $0x50] sm:$0xff]   ;;  %v77_v51 = vshrl.u32 %v76_v50, 7 }
  0x45   :  { %v736_v39 = vld [vmem:[#allocation7] sm:$0xff]   ;;  %650 = vmatprep.subr.bf16.mxu0 %v735_v38  ;;  %v738_v41 = vld [vmem:[#allocation7 + $0x8] sm:$0xff]   ;;  %v740_v43 = vld [vmem:[#allocation7 + $0x10] sm:$0xff]  }
  0x46   :  { %651 = vmatpush3.bf16.msra.mxu0 %v736_v39  ;;  %v741_v44 = vld [vmem:[#allocation7 + $0x58] sm:$0xff]   ;;  %v743_v46 = vld [vmem:[#allocation7 + $0x60] sm:$0xff]   ;;  %v745_v48 = vld [vmem:[#allocation7 + $0x68] sm:$0xff]   ;;  %v78_v52 = vsub.s32 0, %v77_v51  ;;  %v82_v54 = vsub.s32 1, %v77_v51 }
  0x47   :  { %366 = vmatpush1.bf16.msra.mxu1 %v698_v13  ;;  %652 = vmatprep.subr.bf16.mxu0 %v737_v40  ;;  %v742_v45 = vld [vmem:[#allocation7 + $0x18] sm:$0xff]   ;;  %v744_v47 = vld [vmem:[#allocation7 + $0x20] sm:$0xff]   ;;  %v746_v49 = vld [vmem:[#allocation7 + $0x28] sm:$0xff]  }
  0x48   :  { %367 = vmatprep.subr.bf16.mxu1 %v699_v14  ;;  %v74_v53 = vld [vmem:[%s963_s2] sm:$0x3]  ;;  %v747_v3 = vld [vmem:[#allocation7 + $0x70] sm:$0xff]   ;;  %v749_v5 = vld [vmem:[#allocation7 + $0x78] sm:$0xff]  }
  0x49   :  { %v79_v55 = vrot.slane %v74_v53, %v78_v52  ;;  %v83_v56 = vrot.slane %v74_v53, %v82_v54  ;;  %v748_v4 = vld [vmem:[#allocation7 + $0x30] sm:$0xff]   ;;  %v750_v6 = vld [vmem:[#allocation7 + $0x38] sm:$0xff]   ;;  %v187_v7 = vld [vmem:[%s965_s4] sm:$0x3]  ;;  %s853_s4 = smov [#allocation8]  }
  0x4a   :  { %653 = vmatpush3.bf16.msra.mxu0 %v738_v41  ;;  %v192_v8 = vrot.slane %v187_v7, %v78_v52  ;;  %v196_v9 = vrot.slane %v187_v7, %v82_v54  ;;  %s586_s21 = sshll.u32 %s853_s4, 4  ;;  %s587_s21 = int_to_ptr.vmem [resolvable:$true] %s586_s21 }
  0x4b   :  { %368 = vmatpush1.bf16.msra.mxu1 %v701_v15  ;;  %654 = vmatprep.subr.bf16.mxu0 %v739_v42  ;;  %s817_s22 = scalar_lea.vmem %s587_s21, 128  ;;  %p822_p11 = scmp.lt.s32.totalorder %s587_s21, %s587_s21 }
  0x4c   :  { %369 = vmatprep.subr.bf16.mxu1 %v702_v16  ;;  %p818_p10 = scmp.ne.s32.totalorder %s587_s21, %s817_s22  ;;  %p823_p12 = scmp.lt.s32.totalorder %s817_s22, %s817_s22 }
  0x4e   :  { %655 = vmatpush3.bf16.msra.mxu0 %v740_v43  ;;  %p824_p13 = por %p823_p12, %p822_p11 }
  0x4f   :  { %370 = vmatpush1.bf16.msra.mxu1 %v704_v17  ;;  %656 = vmatprep.subr.bf16.mxu0 %v741_v44 }
  0x50   :  { %371 = vmatprep.subr.bf16.mxu1 %v705_v18  ;;  %p825_p0 = pnand %p824_p13, %p818_p10 }
  0x52   :  { %657 = vmatpush3.bf16.msra.mxu0 %v742_v45 }
  0x53   :  { %372 = vmatpush1.bf16.msra.mxu1 %v707_v19  ;;  %658 = vmatprep.subr.bf16.mxu0 %v743_v46 }
  0x54   :  { %373 = vmatprep.subr.bf16.mxu1 %v708_v20 }
  0x56   :  { %659 = vmatpush3.bf16.msra.mxu0 %v744_v47 }
  0x57   :  { %374 = vmatpush1.bf16.msra.mxu1 %v710_v21  ;;  %660 = vmatprep.subr.bf16.mxu0 %v745_v48  ;;  %v633_v21 = vld [vmem:[%s967_s6] ss:$0 sm:$0xff] }
  0x58   :  { %375 = vmatprep.subr.bf16.mxu1 %v711_v22 }
  0x5a   :  { %661 = vmatpush3.bf16.msra.mxu0 %v746_v49 }
  0x5b   :  { %376 = vmatpush1.bf16.msra.mxu1 %v713_v23  ;;  %662 = vmatprep.subr.bf16.mxu0 %v747_v3 }
  0x5c   :  { %377 = vmatprep.subr.bf16.mxu1 %v714_v24 }
  0x5e   :  { %663 = vmatpush3.bf16.msra.mxu0 %v748_v4 }
  0x5f   :  { %378 = vmatpush1.bf16.msra.mxu1 %v716_v25  ;;  %664 = vmatprep.subr.bf16.mxu0 %v749_v5 }
  0x60   :  { %379 = vmatprep.subr.bf16.mxu1 %v717_v26 }
  0x62   :  { %665 = vmatpush3.bf16.msra.mxu0 %v750_v6 }
  0x63   :  { %380 = vmatpush1.bf16.msra.mxu1 %v719_v27 }
  0x64   :  { %381 = vmatprep.subr.bf16.mxu1 %v720_v28 }
  0x67   :  { %382 = vmatpush1.bf16.msra.mxu1 %v722_v29 }
  0x68   :  { %383 = vmatprep.subr.bf16.mxu1 %v723_v30 }
  0x6b   :  { %384 = vmatpush1.bf16.msra.mxu1 %v725_v31 }
  0x6c   :  { %385 = vmatprep.subr.bf16.mxu1 %v726_v32 }
  0x6f   :  { %386 = vmatpush1.bf16.msra.mxu1 %v728_v33 }
  0x70   :  { %387 = vmatprep.subr.bf16.mxu1 %v729_v34 }
  0x73   :  { %388 = vmatpush1.bf16.msra.mxu1 %v731_v35 }
  0x74   :  { %389 = vmatprep.subr.bf16.mxu1 %v732_v36 }
  0x77   :  { %390 = vmatpush1.bf16.msra.mxu1 %v734_v37 }
 0x113   :  { %v144_v57 = vpop.f32.mrb[0].mxu0 }
 0x114   :  { %v145_v58 = vadd.f32 %v144_v57, %v79_v55  ;;  %v146_v59 = vpop.f32.mrb[1].mxu0 }
 0x115   :  { %v147_v60 = vadd.f32 %v146_v59, %v83_v56  ;;  %v148_v61 = vpop.f32.mrb[2].mxu0 }
 0x116   :  { %v151_v62 = vmax.f32 %v145_v58, 0.0  ;;  %v149_v63 = vpop.f32.mrb[3].mxu0 }
 0x117   :  { %v152_v0 = vmax.f32 %v147_v60, 0.0 }
 0x118   :  { %v153_v2 = vpack.c.bf16 %v151_v62, %v151_v62 }
 0x119   :  { %v154_v1 = vpack.c.bf16 %v152_v0, %v152_v0 }
 0x11b   :  { %391 = vmatprep.mubr.bf16.mxu1 %v154_v1 }
 0x11c   :  { %392 = vmatmul.mubr.bf16.vlgmr.msra.gmra.mrb[0].mxu1 %v153_v2 }
 0x1ef   :  { %v393_v10 = vpop.f32.mrb[0].mxu1 }
 0x1f0   :  { %v394_v11 = vadd.f32 %v393_v10, %v192_v8  ;;  %v395_v12 = vpop.f32.mrb[1].mxu1 }
 0x1f1   :  { %v396_v13 = vadd.f32 %v395_v12, %v196_v9  ;;  %v397_v14 = vpop.f32.mrb[2].mxu1 }
 0x1f2   :  { %v400_v15 = vmax.f32 %v394_v11, 0.0  ;;  %v398_v16 = vpop.f32.mrb[3].mxu1 }
 0x1f3   :  { %v401_v17 = vmax.f32 %v396_v13, 0.0 }
 0x1f4   :  { %v402_v19 = vpack.c.bf16 %v400_v15, %v400_v15 }
 0x1f5   :  { %v403_v18 = vpack.c.bf16 %v401_v17, %v401_v17 }
 0x1f7   :  { %571 = vmatprep.mubr.bf16.mxu0 %v403_v18 }
 0x1f8   :  { %572 = vmatmul.mubr.bf16.vlgmr.msra.gmra.mrb[4].mxu0 %v402_v19 }
 0x2cb   :  { %v666_v20 = vpop.f32.mrb[4].mxu0 }
 0x2cc   :  { %v667_v22 = vpop.f32.mrb[5].mxu0 }
 0x2cd   :  { %v668_v23 = vadd.f32 %v667_v22, %v666_v20  ;;  %v669_v24 = vpop.f32.mrb[6].mxu0 }
 0x2ce   :  { %v670_v25 = vpop.f32.mrb[7].mxu0 }
 0x2cf   :  { %v574_v26 = vadd.f32 %v668_v23, %v633_v21 }
 0x2d1   :  { %579 = vst [vmem:[#allocation8] sm:$0xff] %v574_v26 }
 0x2d2   :  { %828 = shalt.err (!%p825_p0)
}
 0x2d3   :  { %s829_s6 = scalar_lea.hbm %s968_s7, 128 }
 0x2d4   :  { %p830_p1 = scmp.ne.s32.totalorder %s968_s7, %s829_s6  ;;  %p833_p2 = scmp.lt.u32.totalorder %s829_s6, %s968_s7 }
 0x2d6   :  { %p835_p3 = pnand %p833_p2, %p830_p1 }
 0x2d8   :  { %838 = shalt.err (!%p835_p3)
}
 0x2d9   :  { %589 = dma.vmem_to_hbm [thread:$0]  %s587_s21, 128, %s968_s7, [#allocation4]  }
 0x2da   :  { %843 = dma.done.wait [#allocation4], 128  }
 0x2db   :  { %844 = vsyncadd [#allocation4], 4294967168 }
 0x2dc   :  { %593 = vsyncpa [#allocation3], 1 }
 0x2dd   :  { %594 = vsyncpa [#allocation6], 1 }
 0x2de   :  { %595 = vsyncpa [#allocation4], 1 }

</bundles_post_ra>
